<compile_context>
chip_gen: v7x
topology: tpu7x:2x2x1
jax: 0.10.0
libtpu: 0.0.40
codegen_flags: <defaults>
</compile_context>

<pallas_src>
import functools

import jax
import jax.numpy as jnp
import numpy as np
from jax.experimental import pallas as pl
from jax.experimental.pallas import tpu as pltpu


# ----------------------------------------------------------------------------
# Fused DEBlock kernel: conv1(+b1) -> ReLU -> +x -> conv2(+b2) -> +x
# Everything for one (lane-packed) image block stays in VMEM / vregs.
# ----------------------------------------------------------------------------
def _deblock_kernel(x_ref, m1_ref, b1_ref, m2_ref, b2_ref, out_ref, pad_ref,
                    *, H, WCL):
    # x_ref   : (1, H, WCL)   lane-dense activations, compute dtype
    #                         (WCL = lane_pack * W * C, width-padding folded)
    # m1_ref  : (3, WCL, WCL) row-banded, block-diagonal DEConv weight
    # b1_ref  : (1, WCL)      DEConv bias tiled over (lane_pack*W), f32
    # m2_ref  : (3, WCL, WCL) row-banded, block-diagonal conv2 weight
    # b2_ref  : (1, WCL)      conv2 bias tiled, f32
    # out_ref : (1, H, WCL)
    # pad_ref : (H+2, WCL)    compute-dtype scratch, shared by both convs

    def banded_conv3x3(m_ref):
        # y[h, :] = sum_kh  pad[h+kh, :] @ M[kh]   (f32 accumulation)
        # NOTE: kh = 1, 2 give non-8-aligned sublane slice starts; if Mosaic
        # materializes relayout copies here (v5e), pad the row count / use an
        # XLU sublane rotate instead.
        acc = jnp.zeros((H, WCL), jnp.float32)
        for kh in range(3):
            acc = acc + jnp.dot(pad_ref[kh:kh + H, :], m_ref[kh],
                                preferred_element_type=jnp.float32)
        return acc

    x = x_ref[0]                      # (H, WCL), compute dtype
    x_f32 = x.astype(jnp.float32)     # residual (rounded-to-compute, like ref)

    # Halo-row-only zeroing: the interior is fully overwritten below every
    # grid step, and there is no lane halo (width padding lives in M[kh]).
    zero_row = jnp.zeros((1, WCL), pad_ref.dtype)
    pad_ref[0:1, :] = zero_row
    pad_ref[H + 1:H + 2, :] = zero_row
    pad_ref[1:H + 1, :] = x

    # conv1 == DEConv (fused / re-parameterized weight), then ReLU + x.
    r = jnp.maximum(banded_conv3x3(m1_ref) + b1_ref[...], 0.0) + x_f32

    # conv2 reuses the same padded scratch: only the interior is rewritten,
    # so the halo rows stay zero.  Intermediate never hits HBM.
    pad_ref[1:H + 1, :] = r.astype(pad_ref.dtype)
    y = banded_conv3x3(m2_ref) + b2_ref[...] + x_f32

    out_ref[0] = y.astype(out_ref.dtype)


# ----------------------------------------------------------------------------
# Weight lowering: 3x3 HWIO conv weight -> 3 row-band matrices (one per kh),
# with the stride-1 / pad-1 WIDTH padding folded in (out-of-range taps
# dropped), so a conv on lane-flattened, width-UNPADDED rows is 3 matmuls:
#   M[kh, iw*Cin + ci, w*Cout + co] = w_hwio[kh, iw-w+1, ci, co]
#                                     for iw = w + kw - 1 in [0, W)
# Weight-only algebra; runs once in plain JAX outside the kernel.
# TODO(synk): bound the W tile (K and band-matrix size grow quadratically in
# the W tile) when images are larger than this toy shape.
# ----------------------------------------------------------------------------
def band_weights(w_hwio, W):
    KH, KW, Cin, Cout = w_hwio.shape
    pad_w = KW // 2
    M = jnp.zeros((KH, W * Cin, W * Cout), w_hwio.dtype)
    for kw in range(KW):
        for w in range(W):
            iw = w + kw - pad_w
            if 0 <= iw < W:
                M = M.at[:, iw * Cin:(iw + 1) * Cin,
                         w * Cout:(w + 1) * Cout].set(w_hwio[:, kw])
    return M


def block_diag_bands(M, P):
    # (3, K, N) -> (3, P*K, P*N) block-diagonal, so P images packed along the
    # lane axis are convolved independently by one matmul.
    if P == 1:
        return M
    KH, K, N = M.shape
    out = jnp.zeros((KH, P * K, P * N), M.dtype)
    for p in range(P):
        out = out.at[:, p * K:(p + 1) * K, p * N:(p + 1) * N].set(M)
    return out


# ----------------------------------------------------------------------------
# DEConv weight re-parameterization (matches the PyTorch get_weight()s).
# All weights are OIHW = (out_channels, in_channels, 3, 3).
# ----------------------------------------------------------------------------
def deconv_fuse_weights(w_cd, w_hd, w_vd, w_ad, w_std,
                        b_cd, b_hd, b_vd, b_ad, b_std, theta=1.0):
    Cout, Cin = w_cd.shape[:2]

    # Conv2d_cd: center tap -> center - sum(all 9 taps)
    wc = w_cd.reshape(Cout, Cin, 9)
    wc = wc.at[:, :, 4].set(wc[:, :, 4] - wc.sum(-1))
    wc = wc.reshape(Cout, Cin, 3, 3)

    # Conv2d_hd: column 0 kept, column 2 = -column 0, rest zero
    wh = jnp.zeros_like(w_hd)
    wh = wh.at[:, :, :, 0].set(w_hd[:, :, :, 0])
    wh = wh.at[:, :, :, 2].set(-w_hd[:, :, :, 0])

    # Conv2d_vd: row 0 kept, row 2 = -row 0, rest zero
    wv = jnp.zeros_like(w_vd)
    wv = wv.at[:, :, 0, :].set(w_vd[:, :, 0, :])
    wv = wv.at[:, :, 2, :].set(-w_vd[:, :, 0, :])

    # Conv2d_ad: w - theta * w[permutation]
    perm = jnp.array([3, 0, 1, 6, 4, 2, 7, 8, 5], dtype=jnp.int32)
    wa = w_ad.reshape(Cout, Cin, 9)
    wa = (wa - theta * wa[:, :, perm]).reshape(Cout, Cin, 3, 3)

    w = wc + wh + wv + wa + w_std
    b = b_cd + b_hd + b_vd + b_ad + b_std
    return w, b


# ----------------------------------------------------------------------------
# Public wrapper (NCHW in / NCHW out, like the PyTorch module).
# TODO(synk): accept/return NHWC end-to-end from the surrounding model to
# drop the wrapper-side relayout transposes (full HBM round trips).
# ----------------------------------------------------------------------------
@functools.partial(jax.jit, static_argnames=("compute_dtype", "lane_pack"))
def deblock_pallas(x_nchw, w1_oihw, b1, w2_oihw, b2, *,
                   compute_dtype=jnp.bfloat16, lane_pack=None):
    N, C, H, W = x_nchw.shape
    assert w1_oihw.shape[:2] == (C, C) and w2_oihw.shape[:2] == (C, C)
    WC = W * C

    # Pack P images side by side along the lane axis so the output lane
    # width P*W*C reaches 128 (unmasked stores / full VPU width).
    if lane_pack is None:
        lane_pack = max(1, 128 // WC)
        while N % lane_pack:
            lane_pack -= 1
    P = lane_pack
    assert N % P == 0
    NB = N // P
    WCL = P * WC

    # NCHW -> (NB, H, P*W*C): image g*P + p occupies lanes [p*WC, (p+1)*WC)
    # of super-image g, channel-last within each (w, c) pair.
    x_rows = (x_nchw.reshape(NB, P, C, H, W)
              .transpose(0, 3, 1, 4, 2)          # (NB, H, P, W, C)
              .reshape(NB, H, WCL)
              .astype(compute_dtype))

    m1 = block_diag_bands(
        band_weights(jnp.transpose(w1_oihw, (2, 3, 1, 0)), W), P
    ).astype(compute_dtype)
    m2 = block_diag_bands(
        band_weights(jnp.transpose(w2_oihw, (2, 3, 1, 0)), W), P
    ).astype(compute_dtype)
    b1_t = jnp.tile(b1.astype(jnp.float32), P * W).reshape(1, WCL)
    b2_t = jnp.tile(b2.astype(jnp.float32), P * W).reshape(1, WCL)

    kernel = functools.partial(_deblock_kernel, H=H, WCL=WCL)

    # TODO(synk): for large batches, stack several lane-packed images along
    # the sublane axis per grid step (shared zero halo rows) to push the MXU
    # M dimension toward 128/256 and cut per-step overhead.
    # TODO(synk): for large H/W, tile over H rows (2-row halo) / bounded W
    # tiles and set vmem_limit_bytes per generation (v7x has 64 MiB physical
    # / 32 MiB default scoped VMEM); whole-image blocks are fine at these
    # small shapes.
    # TODO(synk): single-buffer the invariant weight/bias blocks
    # (pipeline_mode=pl.Buffered(1)) once the band matrices grow with W tiles.
    out_rows = pl.pallas_call(
        kernel,
        out_shape=jax.ShapeDtypeStruct((NB, H, WCL), x_nchw.dtype),
        grid_spec=pltpu.PrefetchScalarGridSpec(
            num_scalar_prefetch=0,
            grid=(NB,),
            in_specs=[
                pl.BlockSpec((1, H, WCL), lambda n: (n, 0, 0)),
                pl.BlockSpec((3, WCL, WCL), lambda n: (0, 0, 0)),
                pl.BlockSpec((1, WCL), lambda n: (0, 0)),
                pl.BlockSpec((3, WCL, WCL), lambda n: (0, 0, 0)),
                pl.BlockSpec((1, WCL), lambda n: (0, 0)),
            ],
            out_specs=pl.BlockSpec((1, H, WCL), lambda n: (n, 0, 0)),
            scratch_shapes=[
                pltpu.VMEM((H + 2, WCL), compute_dtype),
            ],
        ),
        compiler_params=pltpu.CompilerParams(
            dimension_semantics=("parallel",),
        ),
    )(x_rows, m1, b1_t, m2, b2_t)

    # (NB, H, P*W*C) -> NCHW
    out = (out_rows.reshape(NB, H, P, W, C)
           .transpose(0, 2, 4, 1, 3)              # (NB, P, C, H, W)
           .reshape(N, C, H, W))
    return out


# ----------------------------------------------------------------------------
# Pure-XLA reference. `compute_dtype` mirrors the kernel's MXU operand
# rounding (operands rounded to compute_dtype, all math in f32).
# ----------------------------------------------------------------------------
def deblock_ref(x_nchw, w1_oihw, b1, w2_oihw, b2, *, compute_dtype=jnp.float32):
    f32 = jnp.float32
    q = lambda a: a.astype(compute_dtype).astype(f32)

    def conv(a, w, b):
        y = jax.lax.conv_general_dilated(
            a, w, window_strides=(1, 1), padding=((1, 1), (1, 1)),
            dimension_numbers=("NCHW", "OIHW", "NCHW"),
            precision=jax.lax.Precision.HIGHEST)
        return y + b[None, :, None, None]

    xq = q(x_nchw)
    r = jax.nn.relu(conv(xq, q(w1_oihw), b1.astype(f32))) + xq
    y = conv(q(r), q(w2_oihw), b2.astype(f32)) + xq
    return y


if __name__ == "__main__":
    N, C, H, W = 2, 4, 16, 16  # in_channels == out_channels (residual adds)

    key = jax.random.PRNGKey(0)
    keys = jax.random.split(key, 13)

    x = jax.random.normal(keys[0], (N, C, H, W), jnp.float32)

    def wk(k):
        return 0.1 * jax.random.normal(k, (C, C, 3, 3), jnp.float32)

    def bk(k):
        return 0.1 * jax.random.normal(k, (C,), jnp.float32)

    # DEConv branch parameters + conv2 of DEBlock (deterministic synthetic init)
    w_cd, w_hd, w_vd, w_ad, w_std = [wk(keys[i]) for i in range(1, 6)]
    b_cd, b_hd, b_vd, b_ad, b_std = [bk(keys[i]) for i in range(6, 11)]
    w2 = wk(keys[11])
    b2 = bk(keys[12])

    w1, b1 = deconv_fuse_weights(w_cd, w_hd, w_vd, w_ad, w_std,
                                 b_cd, b_hd, b_vd, b_ad, b_std, theta=1.0)

    # f32 MXU path: tight check against the f32 XLA conv reference.
    out32 = jax.block_until_ready(
        deblock_pallas(x, w1, b1, w2, b2, compute_dtype=jnp.float32))
    ref32 = jax.block_until_ready(
        deblock_ref(x, w1, b1, w2, b2, compute_dtype=jnp.float32))
    assert out32.shape == (N, C, H, W)
    np.testing.assert_allclose(np.asarray(out32), np.asarray(ref32),
                               rtol=1e-4, atol=1e-4)

    # bf16 MXU path (default, per perf guidance): f32 accumulation/elementwise,
    # checked against a reference that mirrors the bf16 operand rounding.
    out16 = jax.block_until_ready(deblock_pallas(x, w1, b1, w2, b2))
    ref16 = jax.block_until_ready(
        deblock_ref(x, w1, b1, w2, b2, compute_dtype=jnp.bfloat16))
    np.testing.assert_allclose(np.asarray(out16), np.asarray(ref16),
                               rtol=2e-2, atol=2e-2)

    print("KERNEL_OK")
</pallas_src>

<mosaic_0001>
module attributes {stable_mosaic.version = 11 : i64} {
  func.func @_deblock_kernel(%arg0: i32, %arg1: memref<1x16x128xf32, #tpu.memory_space<vmem>>, %arg2: memref<3x128x128xf32, #tpu.memory_space<vmem>>, %arg3: memref<1x128xf32, #tpu.memory_space<vmem>>, %arg4: memref<3x128x128xf32, #tpu.memory_space<vmem>>, %arg5: memref<1x128xf32, #tpu.memory_space<vmem>>, %arg6: memref<1x16x128xf32, #tpu.memory_space<vmem>>, %arg7: memref<18x128xf32, #tpu.memory_space<vmem>>) attributes {dimension_semantics = [#tpu.dimension_semantics<parallel>], iteration_bounds = array<i64: 1>, scalar_prefetch = 0 : i64, scratch_operands = 1 : i64, tpu.core_type = #tpu.core_type<tc>, window_params = [{transform_indices = @transform_0, window_bounds = array<i64: 1, 16, 128>}, {pipeline_mode = #tpu.pipeline_mode<synchronous>, transform_indices = @transform_1, window_bounds = array<i64: 3, 128, 128>}, {pipeline_mode = #tpu.pipeline_mode<synchronous>, transform_indices = @transform_2, window_bounds = array<i64: 1, 128>}, {pipeline_mode = #tpu.pipeline_mode<synchronous>, transform_indices = @transform_3, window_bounds = array<i64: 3, 128, 128>}, {pipeline_mode = #tpu.pipeline_mode<synchronous>, transform_indices = @transform_4, window_bounds = array<i64: 1, 128>}, {transform_indices = @transform_5, window_bounds = array<i64: 1, 16, 128>}]} {
    %c0 = arith.constant 0 : index
    %c0_0 = arith.constant 0 : index
    %c0_1 = arith.constant 0 : index
    %0 = vector.load %arg1[%c0, %c0_0, %c0_1] : memref<1x16x128xf32, #tpu.memory_space<vmem>>, vector<1x16x128xf32>
    %1 = vector.shape_cast %0 : vector<1x16x128xf32> to vector<16x128xf32>
    %cst = arith.constant 0.000000e+00 : f32
    %2 = vector.broadcast %cst : f32 to vector<1x128xf32>
    %c0_2 = arith.constant 0 : index
    %c0_3 = arith.constant 0 : index
    %3 = vector.load %arg7[%c0_2, %c0_3] : memref<18x128xf32, #tpu.memory_space<vmem>>, vector<1x128xf32>
    tpu.vector_store %arg7[%c0_2, %c0_3], %2 {strides = array<i32>} : memref<18x128xf32, #tpu.memory_space<vmem>>, vector<1x128xf32>,
    %c17 = arith.constant 17 : index
    %c0_4 = arith.constant 0 : index
    %4 = vector.load %arg7[%c17, %c0_4] : memref<18x128xf32, #tpu.memory_space<vmem>>, vector<1x128xf32>
    tpu.vector_store %arg7[%c17, %c0_4], %2 {strides = array<i32>} : memref<18x128xf32, #tpu.memory_space<vmem>>, vector<1x128xf32>,
    %c1 = arith.constant 1 : index
    %c0_5 = arith.constant 0 : index
    %5 = vector.load %arg7[%c1, %c0_5] : memref<18x128xf32, #tpu.memory_space<vmem>>, vector<16x128xf32>
    tpu.vector_store %arg7[%c1, %c0_5], %1 {strides = array<i32>} : memref<18x128xf32, #tpu.memory_space<vmem>>, vector<16x128xf32>,
    %cst_6 = arith.constant 0.000000e+00 : f32
    %6 = vector.broadcast %cst_6 : f32 to vector<16x128xf32>
    %c0_7 = arith.constant 0 : index
    %c0_8 = arith.constant 0 : index
    %7 = vector.load %arg7[%c0_7, %c0_8] : memref<18x128xf32, #tpu.memory_space<vmem>>, vector<16x128xf32>
    %c0_9 = arith.constant 0 : index
    %c0_10 = arith.constant 0 : index
    %c0_11 = arith.constant 0 : index
    %8 = vector.load %arg2[%c0_9, %c0_10, %c0_11] : memref<3x128x128xf32, #tpu.memory_space<vmem>>, vector<1x128x128xf32>
    %9 = vector.shape_cast %8 : vector<1x128x128xf32> to vector<128x128xf32>
    %cst_12 = arith.constant dense<0.000000e+00> : vector<16x128xf32>
    %10 = tpu.matmul %7, %9, %cst_12 {dimension_numbers = #tpu.dot_dimension_numbers<[1], [0], [0], [1], [0, 0, 1, 1], [], []>} : vector<16x128xf32>, vector<128x128xf32>, vector<16x128xf32> -> vector<16x128xf32>
    %11 = arith.addf %6, %10 : vector<16x128xf32>
    %c1_13 = arith.constant 1 : index
    %c0_14 = arith.constant 0 : index
    %12 = vector.load %arg7[%c1_13, %c0_14] : memref<18x128xf32, #tpu.memory_space<vmem>>, vector<16x128xf32>
    %c1_15 = arith.constant 1 : index
    %c0_16 = arith.constant 0 : index
    %c0_17 = arith.constant 0 : index
    %13 = vector.load %arg2[%c1_15, %c0_16, %c0_17] : memref<3x128x128xf32, #tpu.memory_space<vmem>>, vector<1x128x128xf32>
    %14 = vector.shape_cast %13 : vector<1x128x128xf32> to vector<128x128xf32>
    %cst_18 = arith.constant dense<0.000000e+00> : vector<16x128xf32>
    %15 = tpu.matmul %12, %14, %cst_18 {dimension_numbers = #tpu.dot_dimension_numbers<[1], [0], [0], [1], [0, 0, 1, 1], [], []>} : vector<16x128xf32>, vector<128x128xf32>, vector<16x128xf32> -> vector<16x128xf32>
    %16 = arith.addf %11, %15 : vector<16x128xf32>
    %c2 = arith.constant 2 : index
    %c0_19 = arith.constant 0 : index
    %17 = vector.load %arg7[%c2, %c0_19] : memref<18x128xf32, #tpu.memory_space<vmem>>, vector<16x128xf32>
    %c2_20 = arith.constant 2 : index
    %c0_21 = arith.constant 0 : index
    %c0_22 = arith.constant 0 : index
    %18 = vector.load %arg2[%c2_20, %c0_21, %c0_22] : memref<3x128x128xf32, #tpu.memory_space<vmem>>, vector<1x128x128xf32>
    %19 = vector.shape_cast %18 : vector<1x128x128xf32> to vector<128x128xf32>
    %cst_23 = arith.constant dense<0.000000e+00> : vector<16x128xf32>
    %20 = tpu.matmul %17, %19, %cst_23 {dimension_numbers = #tpu.dot_dimension_numbers<[1], [0], [0], [1], [0, 0, 1, 1], [], []>} : vector<16x128xf32>, vector<128x128xf32>, vector<16x128xf32> -> vector<16x128xf32>
    %21 = arith.addf %16, %20 : vector<16x128xf32>
    %c0_24 = arith.constant 0 : index
    %c0_25 = arith.constant 0 : index
    %22 = vector.load %arg3[%c0_24, %c0_25] : memref<1x128xf32, #tpu.memory_space<vmem>>, vector<1x128xf32>
    %23 = vector.broadcast %22 : vector<1x128xf32> to vector<16x128xf32>
    %24 = arith.addf %21, %23 : vector<16x128xf32>
    %cst_26 = arith.constant 0.000000e+00 : f32
    %25 = vector.broadcast %cst_26 : f32 to vector<16x128xf32>
    %26 = arith.maximumf %24, %25 : vector<16x128xf32>
    %27 = arith.addf %26, %1 : vector<16x128xf32>
    %c1_27 = arith.constant 1 : index
    %c0_28 = arith.constant 0 : index
    %28 = vector.load %arg7[%c1_27, %c0_28] : memref<18x128xf32, #tpu.memory_space<vmem>>, vector<16x128xf32>
    tpu.vector_store %arg7[%c1_27, %c0_28], %27 {strides = array<i32>} : memref<18x128xf32, #tpu.memory_space<vmem>>, vector<16x128xf32>,
    %cst_29 = arith.constant 0.000000e+00 : f32
    %29 = vector.broadcast %cst_29 : f32 to vector<16x128xf32>
    %c0_30 = arith.constant 0 : index
    %c0_31 = arith.constant 0 : index
    %30 = vector.load %arg7[%c0_30, %c0_31] : memref<18x128xf32, #tpu.memory_space<vmem>>, vector<16x128xf32>
    %c0_32 = arith.constant 0 : index
    %c0_33 = arith.constant 0 : index
    %c0_34 = arith.constant 0 : index
    %31 = vector.load %arg4[%c0_32, %c0_33, %c0_34] : memref<3x128x128xf32, #tpu.memory_space<vmem>>, vector<1x128x128xf32>
    %32 = vector.shape_cast %31 : vector<1x128x128xf32> to vector<128x128xf32>
    %cst_35 = arith.constant dense<0.000000e+00> : vector<16x128xf32>
    %33 = tpu.matmul %30, %32, %cst_35 {dimension_numbers = #tpu.dot_dimension_numbers<[1], [0], [0], [1], [0, 0, 1, 1], [], []>} : vector<16x128xf32>, vector<128x128xf32>, vector<16x128xf32> -> vector<16x128xf32>
    %34 = arith.addf %29, %33 : vector<16x128xf32>
    %c1_36 = arith.constant 1 : index
    %c0_37 = arith.constant 0 : index
    %35 = vector.load %arg7[%c1_36, %c0_37] : memref<18x128xf32, #tpu.memory_space<vmem>>, vector<16x128xf32>
    %c1_38 = arith.constant 1 : index
    %c0_39 = arith.constant 0 : index
    %c0_40 = arith.constant 0 : index
    %36 = vector.load %arg4[%c1_38, %c0_39, %c0_40] : memref<3x128x128xf32, #tpu.memory_space<vmem>>, vector<1x128x128xf32>
    %37 = vector.shape_cast %36 : vector<1x128x128xf32> to vector<128x128xf32>
    %cst_41 = arith.constant dense<0.000000e+00> : vector<16x128xf32>
    %38 = tpu.matmul %35, %37, %cst_41 {dimension_numbers = #tpu.dot_dimension_numbers<[1], [0], [0], [1], [0, 0, 1, 1], [], []>} : vector<16x128xf32>, vector<128x128xf32>, vector<16x128xf32> -> vector<16x128xf32>
    %39 = arith.addf %34, %38 : vector<16x128xf32>
    %c2_42 = arith.constant 2 : index
    %c0_43 = arith.constant 0 : index
    %40 = vector.load %arg7[%c2_42, %c0_43] : memref<18x128xf32, #tpu.memory_space<vmem>>, vector<16x128xf32>
    %c2_44 = arith.constant 2 : index
    %c0_45 = arith.constant 0 : index
    %c0_46 = arith.constant 0 : index
    %41 = vector.load %arg4[%c2_44, %c0_45, %c0_46] : memref<3x128x128xf32, #tpu.memory_space<vmem>>, vector<1x128x128xf32>
    %42 = vector.shape_cast %41 : vector<1x128x128xf32> to vector<128x128xf32>
    %cst_47 = arith.constant dense<0.000000e+00> : vector<16x128xf32>
    %43 = tpu.matmul %40, %42, %cst_47 {dimension_numbers = #tpu.dot_dimension_numbers<[1], [0], [0], [1], [0, 0, 1, 1], [], []>} : vector<16x128xf32>, vector<128x128xf32>, vector<16x128xf32> -> vector<16x128xf32>
    %44 = arith.addf %39, %43 : vector<16x128xf32>
    %c0_48 = arith.constant 0 : index
    %c0_49 = arith.constant 0 : index
    %45 = vector.load %arg5[%c0_48, %c0_49] : memref<1x128xf32, #tpu.memory_space<vmem>>, vector<1x128xf32>
    %46 = vector.broadcast %45 : vector<1x128xf32> to vector<16x128xf32>
    %47 = arith.addf %44, %46 : vector<16x128xf32>
    %48 = arith.addf %47, %1 : vector<16x128xf32>
    %c0_50 = arith.constant 0 : index
    %c0_51 = arith.constant 0 : index
    %c0_52 = arith.constant 0 : index
    %49 = vector.load %arg6[%c0_50, %c0_51, %c0_52] : memref<1x16x128xf32, #tpu.memory_space<vmem>>, vector<1x16x128xf32>
    %50 = vector.shape_cast %49 : vector<1x16x128xf32> to vector<16x128xf32>
    %51 = vector.shape_cast %48 : vector<16x128xf32> to vector<1x16x128xf32>
    tpu.vector_store %arg6[%c0_50, %c0_51, %c0_52], %51 {strides = array<i32>} : memref<1x16x128xf32, #tpu.memory_space<vmem>>, vector<1x16x128xf32>,
    return
  }
  func.func @transform_0(%arg0: i32) -> (i32, i32, i32) {
    %c0_i32 = arith.constant 0 : i32
    %c0_i32_0 = arith.constant 0 : i32
    %c0_i32_1 = arith.constant 0 : i32
    return %arg0, %c0_i32, %c0_i32_0 : i32, i32, i32
  }
  func.func @transform_1(%arg0: i32) -> (i32, i32, i32) {
    %c0_i32 = arith.constant 0 : i32
    %c0_i32_0 = arith.constant 0 : i32
    %c0_i32_1 = arith.constant 0 : i32
    %c0_i32_2 = arith.constant 0 : i32
    return %c0_i32, %c0_i32_0, %c0_i32_1 : i32, i32, i32
  }
  func.func @transform_2(%arg0: i32) -> (i32, i32) {
    %c0_i32 = arith.constant 0 : i32
    %c0_i32_0 = arith.constant 0 : i32
    %c0_i32_1 = arith.constant 0 : i32
    return %c0_i32, %c0_i32_0 : i32, i32
  }
  func.func @transform_3(%arg0: i32) -> (i32, i32, i32) {
    %c0_i32 = arith.constant 0 : i32
    %c0_i32_0 = arith.constant 0 : i32
    %c0_i32_1 = arith.constant 0 : i32
    %c0_i32_2 = arith.constant 0 : i32
    return %c0_i32, %c0_i32_0, %c0_i32_1 : i32, i32, i32
  }
  func.func @transform_4(%arg0: i32) -> (i32, i32) {
    %c0_i32 = arith.constant 0 : i32
    %c0_i32_0 = arith.constant 0 : i32
    %c0_i32_1 = arith.constant 0 : i32
    return %c0_i32, %c0_i32_0 : i32, i32
  }
  func.func @transform_5(%arg0: i32) -> (i32, i32, i32) {
    %c0_i32 = arith.constant 0 : i32
    %c0_i32_0 = arith.constant 0 : i32
    %c0_i32_1 = arith.constant 0 : i32
    return %arg0, %c0_i32, %c0_i32_0 : i32, i32, i32
  }
}

</mosaic_0001>

<bundles_post_ra>
// kernel: tile.13
= control target key start
LH: loop header
LB: loop body
LE: loop exit
PB: predicated region body
PF: predicated region fallthrough
CT: control target
= control target key end

     0   :  { %s40_s0 = inlined_call_operand.vmem [shape: f32[4], index: 0, kind: input, shape index: {}]   ;;  %s41_s1 = inlined_call_operand.vmem [shape: f32[32,4], index: 1, kind: output, shape index: {}]  }
   0x1   :  { %v4_v0 = vld [vmem:[%s40_s0] ss:$0 sm:$0xff] }
   0x2   :  { %5 = vst [vmem:[%s41_s1] sm:$0xff] %v4_v0  ;;  %12 = vst [vmem:[%s41_s1 + $0x8] sm:$0xff] %v4_v0 }
   0x3   :  { %13 = vst [vmem:[%s41_s1 + $0x10] sm:$0xff] %v4_v0  ;;  %14 = vst [vmem:[%s41_s1 + $0x18] sm:$0xff] %v4_v0 }

// kernel: tile.14
= control target key start
LH: loop header
LB: loop body
LE: loop exit
PB: predicated region body
PF: predicated region fallthrough
CT: control target
= control target key end

     0   :  { %s259_s10 = smov 124   ;;  %s260_s11 = smov 116   ;;  %vm3_vm0 = vcmask 31744   ;;  %vm9_vm1 = vcmask 1048544   ;;  %vm15_vm2 = vcmask 1015744   ;;  %vm21_vm3 = vcmask 982944   ;;  %s399_s0 = inlined_call_operand.vmem [shape: f32[32,4], index: 0, kind: input, shape index: {}]   ;;  %s400_s1 = inlined_call_operand.vmem [shape: f32[1,128], index: 1, kind: output, shape index: {}]  }
   0x1   :  { %v197_v0 = vld [vmem:[%s399_s0 + $0x1f] sm:$0x1]   ;;  %v199_v1 = vld [vmem:[%s399_s0 + $0x1d] sm:$0x1]   ;;  %v198_v2 = vld [vmem:[%s399_s0 + $0x1e] sm:$0x1]  }
   0x2   :  { %7 = vrot.lane.b32.xlu0 %v197_v0, %s259_s10  ;;  %19 = vrot.lane.b32.xlu1 %v199_v1, %s260_s11  ;;  %v200_v3 = vld [vmem:[%s399_s0 + $0x1c] sm:$0x1]   ;;  %s261_s16 = smov 120   ;;  %s262_s17 = smov 112   ;;  %v201_v4 = vld [vmem:[%s399_s0 + $0x1b] sm:$0x1]  }
   0x3   :  { %v202_v5 = vld [vmem:[%s399_s0 + $0x1a] sm:$0x1]   ;;  %s263_s22 = smov 108   ;;  %s264_s23 = smov 104   ;;  %v203_v6 = vld [vmem:[%s399_s0 + $0x19] sm:$0x1]  }
   0x4   :  { %v204_v7 = vld [vmem:[%s399_s0 + $0x18] sm:$0x1]   ;;  %s265_s28 = smov 100   ;;  %s266_s29 = smov 96   ;;  %v205_v8 = vld [vmem:[%s399_s0 + $0x17] sm:$0x1]  }
   0x5   :  { %v206_v9 = vld [vmem:[%s399_s0 + $0x16] sm:$0x1]   ;;  %v2_v10 = vld [vmem:[%s399_s0] sm:$0x1]   ;;  %s267_s7 = smov 92   ;;  %s268_s8 = smov 88  }
   0x6   :  { %13 = vrot.lane.b32.xlu0 %v198_v2, %s261_s16  ;;  %25 = vrot.lane.b32.xlu1 %v200_v3, %s262_s17  ;;  %4 = vst.msk [vmem:[#allocation0] sm:$0x1] %vm3_vm0, %v2_v10   ;;  %v207_v11 = vld [vmem:[%s399_s0 + $0x15] sm:$0x1]   ;;  %v208_v12 = vld [vmem:[%s399_s0 + $0x14] sm:$0x1]  }
   0x7   :  { %s269_s13 = smov 84   ;;  %s270_s14 = smov 80   ;;  %v209_v13 = vld [vmem:[%s399_s0 + $0x13] sm:$0x1]   ;;  %v210_v14 = vld [vmem:[%s399_s0 + $0x12] sm:$0x1]  }
   0x8   :  { %s271_s19 = smov 76   ;;  %s272_s20 = smov 72   ;;  %v211_v15 = vld [vmem:[%s399_s0 + $0x11] sm:$0x1]   ;;  %v212_v16 = vld [vmem:[%s399_s0 + $0x10] sm:$0x1]  }
   0x9   :  { %s273_s25 = smov 68   ;;  %s274_s26 = smov 64   ;;  %v213_v17 = vld [vmem:[%s399_s0 + $0xf] sm:$0x1]   ;;  %v214_v18 = vld [vmem:[%s399_s0 + $0xe] sm:$0x1]  }
   0xa   :  { %31 = vrot.lane.b32.xlu0 %v201_v4, %s263_s22  ;;  %37 = vrot.lane.b32.xlu1 %v202_v5, %s264_s23  ;;  %s275_s2 = smov 60   ;;  %s276_s3 = smov 56   ;;  %v215_v19 = vld [vmem:[%s399_s0 + $0xd] sm:$0x1]   ;;  %v216_v20 = vld [vmem:[%s399_s0 + $0xc] sm:$0x1]  }
   0xb   :  { %s278_s9 = smov 48   ;;  %v217_v21 = vld [vmem:[%s399_s0 + $0xb] sm:$0x1]   ;;  %v218_v22 = vld [vmem:[%s399_s0 + $0xa] sm:$0x1]   ;;  %s280_s15 = smov 40  }
   0xc   :  { %v219_v23 = vld [vmem:[%s399_s0 + $0x9] sm:$0x1]   ;;  %v220_v24 = vld [vmem:[%s399_s0 + $0x8] sm:$0x1]   ;;  %s282_s21 = smov 32   ;;  %s284_s27 = smov 24  }
   0xd   :  { %v221_v25 = vld [vmem:[%s399_s0 + $0x7] sm:$0x1]   ;;  %v222_v26 = vld [vmem:[%s399_s0 + $0x6] sm:$0x1]   ;;  %v223_v27 = vld [vmem:[%s399_s0 + $0x5] sm:$0x1]  }
   0xe   :  { %43 = vrot.lane.b32.xlu0 %v203_v6, %s265_s28  ;;  %49 = vrot.lane.b32.xlu1 %v204_v7, %s266_s29  ;;  %v224_v28 = vld [vmem:[%s399_s0 + $0x4] sm:$0x1]   ;;  %s286_s4 = smov 16   ;;  %v225_v29 = vld [vmem:[%s399_s0 + $0x3] sm:$0x1]   ;;  %s288_s10 = smov 8  }
   0xf   :  { %v226_v30 = vld [vmem:[%s399_s0 + $0x2] sm:$0x1]   ;;  %v227_v31 = vld [vmem:[%s399_s0 + $0x1] sm:$0x1]   ;;  %s289_s0 = smov 4   ;;  %vm27_vm4 = vcmask 950144  }
  0x10   :  { %vm33_vm5 = vcmask 917344   ;;  %vm39_vm6 = vcmask 884544   ;;  %vm45_vm7 = vcmask 851744   ;;  %vm51_vm8 = vcmask 818944  }
  0x11   :  { %vm57_vm9 = vcmask 786144   ;;  %vm63_vm10 = vcmask 753344   ;;  %vm69_vm11 = vcmask 720544   ;;  %vm75_vm12 = vcmask 687744  }
  0x12   :  { %55 = vrot.lane.b32.xlu0 %v205_v8, %s267_s7  ;;  %61 = vrot.lane.b32.xlu1 %v206_v9, %s268_s8  ;;  %s277_s8 = smov 52   ;;  %vm81_vm13 = vcmask 654944   ;;  %vm87_vm14 = vcmask 622144   ;;  %vm93_vm15 = vcmask 589344   ;;  %vm99_vm0 = vcmask 556544  }
  0x16   :  { %67 = vrot.lane.b32.xlu0 %v207_v11, %s269_s13  ;;  %73 = vrot.lane.b32.xlu1 %v208_v12, %s270_s14  ;;  %s279_s14 = smov 44  }
  0x1a   :  { %79 = vrot.lane.b32.xlu0 %v209_v13, %s271_s19  ;;  %85 = vrot.lane.b32.xlu1 %v210_v14, %s272_s20  ;;  %s281_s20 = smov 36  }
  0x1e   :  { %91 = vrot.lane.b32.xlu0 %v211_v15, %s273_s25  ;;  %97 = vrot.lane.b32.xlu1 %v212_v16, %s274_s26  ;;  %s283_s26 = smov 28  }
  0x22   :  { %103 = vrot.lane.b32.xlu0 %v213_v17, %s275_s2  ;;  %109 = vrot.lane.b32.xlu1 %v214_v18, %s276_s3  ;;  %s285_s3 = smov 20  }
  0x26   :  { %115 = vrot.lane.b32.xlu0 %v215_v19, %s277_s8  ;;  %121 = vrot.lane.b32.xlu1 %v216_v20, %s278_s9  ;;  %s287_s9 = smov 12  }
  0x2a   :  { %127 = vrot.lane.b32.xlu0 %v217_v21, %s279_s14  ;;  %133 = vrot.lane.b32.xlu1 %v218_v22, %s280_s15 }
  0x2e   :  { %139 = vrot.lane.b32.xlu0 %v219_v23, %s281_s20  ;;  %145 = vrot.lane.b32.xlu1 %v220_v24, %s282_s21 }
  0x32   :  { %151 = vrot.lane.b32.xlu0 %v221_v25, %s283_s26  ;;  %157 = vrot.lane.b32.xlu1 %v222_v26, %s284_s27 }
  0x36   :  { %163 = vrot.lane.b32.xlu0 %v223_v27, %s285_s3  ;;  %169 = vrot.lane.b32.xlu1 %v224_v28, %s286_s4 }
  0x3a   :  { %175 = vrot.lane.b32.xlu0 %v225_v29, %s287_s9  ;;  %181 = vrot.lane.b32.xlu1 %v226_v30, %s288_s10 }
  0x3e   :  { %187 = vrot.lane.b32.xlu0 %v227_v31, %s289_s0 }
  0x74   :  { %v8_v32 = vpop.permute.xlu0 %7   ;;  %v20_v33 = vpop.permute.xlu1 %19  }
  0x75   :  { %10 = vst.msk [vmem:[#allocation0] sm:$0x1] %vm9_vm1, %v8_v32   ;;  %vm105_vm1 = vcmask 523744  }
  0x78   :  { %v14_v34 = vpop.permute.xlu0 %13   ;;  %v26_v35 = vpop.permute.xlu1 %25  }
  0x79   :  { %16 = vst.msk [vmem:[#allocation0] sm:$0x1] %vm15_vm2, %v14_v34   ;;  %vm111_vm2 = vcmask 490944  }
  0x7a   :  { %22 = vst.msk [vmem:[#allocation0] sm:$0x1] %vm21_vm3, %v20_v33   ;;  %vm117_vm3 = vcmask 458144  }
  0x7b   :  { %28 = vst.msk [vmem:[#allocation0] sm:$0x1] %vm27_vm4, %v26_v35   ;;  %vm123_vm4 = vcmask 425344  }
  0x7c   :  { %v32_v36 = vpop.permute.xlu0 %31   ;;  %v38_v37 = vpop.permute.xlu1 %37  }
  0x7d   :  { %34 = vst.msk [vmem:[#allocation0] sm:$0x1] %vm33_vm5, %v32_v36   ;;  %vm129_vm5 = vcmask 392544  }
  0x7e   :  { %40 = vst.msk [vmem:[#allocation0] sm:$0x1] %vm39_vm6, %v38_v37   ;;  %vm135_vm6 = vcmask 359744  }
  0x80   :  { %v44_v38 = vpop.permute.xlu0 %43   ;;  %v50_v39 = vpop.permute.xlu1 %49  }
  0x81   :  { %46 = vst.msk [vmem:[#allocation0] sm:$0x1] %vm45_vm7, %v44_v38   ;;  %vm141_vm7 = vcmask 326944  }
  0x82   :  { %52 = vst.msk [vmem:[#allocation0] sm:$0x1] %vm51_vm8, %v50_v39   ;;  %vm147_vm8 = vcmask 294144  }
  0x84   :  { %v56_v40 = vpop.permute.xlu0 %55   ;;  %v62_v41 = vpop.permute.xlu1 %61  }
  0x85   :  { %58 = vst.msk [vmem:[#allocation0] sm:$0x1] %vm57_vm9, %v56_v40   ;;  %vm153_vm9 = vcmask 261344  }
  0x86   :  { %64 = vst.msk [vmem:[#allocation0] sm:$0x1] %vm63_vm10, %v62_v41   ;;  %vm159_vm10 = vcmask 228544  }
  0x88   :  { %v68_v42 = vpop.permute.xlu0 %67   ;;  %v74_v43 = vpop.permute.xlu1 %73  }
  0x89   :  { %70 = vst.msk [vmem:[#allocation0] sm:$0x1] %vm69_vm11, %v68_v42   ;;  %vm165_vm11 = vcmask 195744  }
  0x8a   :  { %76 = vst.msk [vmem:[#allocation0] sm:$0x1] %vm75_vm12, %v74_v43   ;;  %vm171_vm12 = vcmask 162944  }
  0x8c   :  { %v80_v44 = vpop.permute.xlu0 %79   ;;  %v86_v45 = vpop.permute.xlu1 %85  }
  0x8d   :  { %82 = vst.msk [vmem:[#allocation0] sm:$0x1] %vm81_vm13, %v80_v44   ;;  %vm177_vm13 = vcmask 130144  }
  0x8e   :  { %88 = vst.msk [vmem:[#allocation0] sm:$0x1] %vm87_vm14, %v86_v45   ;;  %vm183_vm14 = vcmask 97344  }
  0x90   :  { %v92_v46 = vpop.permute.xlu0 %91   ;;  %v98_v47 = vpop.permute.xlu1 %97  }
  0x91   :  { %94 = vst.msk [vmem:[#allocation0] sm:$0x1] %vm93_vm15, %v92_v46   ;;  %vm189_vm15 = vcmask 64544  }
  0x92   :  { %100 = vst.msk [vmem:[#allocation0] sm:$0x1] %vm99_vm0, %v98_v47  }
  0x94   :  { %v104_v48 = vpop.permute.xlu0 %103   ;;  %v110_v49 = vpop.permute.xlu1 %109  }
  0x95   :  { %106 = vst.msk [vmem:[#allocation0] sm:$0x1] %vm105_vm1, %v104_v48  }
  0x96   :  { %112 = vst.msk [vmem:[#allocation0] sm:$0x1] %vm111_vm2, %v110_v49  }
  0x98   :  { %v116_v50 = vpop.permute.xlu0 %115   ;;  %v122_v51 = vpop.permute.xlu1 %121  }
  0x99   :  { %118 = vst.msk [vmem:[#allocation0] sm:$0x1] %vm117_vm3, %v116_v50  }
  0x9a   :  { %124 = vst.msk [vmem:[#allocation0] sm:$0x1] %vm123_vm4, %v122_v51  }
  0x9c   :  { %v128_v52 = vpop.permute.xlu0 %127   ;;  %v134_v53 = vpop.permute.xlu1 %133  }
  0x9d   :  { %130 = vst.msk [vmem:[#allocation0] sm:$0x1] %vm129_vm5, %v128_v52  }
  0x9e   :  { %136 = vst.msk [vmem:[#allocation0] sm:$0x1] %vm135_vm6, %v134_v53  }
  0xa0   :  { %v140_v54 = vpop.permute.xlu0 %139   ;;  %v146_v55 = vpop.permute.xlu1 %145  }
  0xa1   :  { %142 = vst.msk [vmem:[#allocation0] sm:$0x1] %vm141_vm7, %v140_v54  }
  0xa2   :  { %148 = vst.msk [vmem:[#allocation0] sm:$0x1] %vm147_vm8, %v146_v55  }
  0xa4   :  { %v152_v56 = vpop.permute.xlu0 %151   ;;  %v158_v57 = vpop.permute.xlu1 %157  }
  0xa5   :  { %154 = vst.msk [vmem:[#allocation0] sm:$0x1] %vm153_vm9, %v152_v56  }
  0xa6   :  { %160 = vst.msk [vmem:[#allocation0] sm:$0x1] %vm159_vm10, %v158_v57  }
  0xa8   :  { %v164_v58 = vpop.permute.xlu0 %163   ;;  %v170_v59 = vpop.permute.xlu1 %169  }
  0xa9   :  { %166 = vst.msk [vmem:[#allocation0] sm:$0x1] %vm165_vm11, %v164_v58  }
  0xaa   :  { %172 = vst.msk [vmem:[#allocation0] sm:$0x1] %vm171_vm12, %v170_v59  }
  0xac   :  { %v176_v60 = vpop.permute.xlu0 %175   ;;  %v182_v61 = vpop.permute.xlu1 %181  }
  0xad   :  { %178 = vst.msk [vmem:[#allocation0] sm:$0x1] %vm177_vm13, %v176_v60  }
  0xae   :  { %184 = vst.msk [vmem:[#allocation0] sm:$0x1] %vm183_vm14, %v182_v61  }
  0xb0   :  { %v188_v62 = vpop.permute.xlu0 %187  }
  0xb1   :  { %190 = vst.msk [vmem:[#allocation0] sm:$0x1] %vm189_vm15, %v188_v62  }
  0xb8   :  { %v194_v63 = vld [vmem:[#allocation0] sm:$0x1] }
  0xb9   :  { %196 = vst [vmem:[%s400_s1] sm:$0x1] %v194_v63 }

// kernel: deblock_pallas.1
= control target key start
LH: loop header
LB: loop body
LE: loop exit
PB: predicated region body
PF: predicated region fallthrough
CT: control target
= control target key end

     0   :  { %v1209_v3 = vmov 0.0   ;;  %s1558_s1 = inlined_call_operand.vmem [shape: f32[3,128,128], index: 1, kind: input, shape index: {}]   ;;  %s1559_s0 = inlined_call_operand.vmem [shape: f32[1,16,128], index: 0, kind: input, shape index: {}]   ;;  %s1560_s3 = inlined_call_operand.vmem [shape: f32[3,128,128], index: 3, kind: input, shape index: {}]   ;;  %s1561_s2 = inlined_call_operand.vmem [shape: f32[1,128], index: 2, kind: input, shape index: {}]   ;;  %s1562_s4 = inlined_call_operand.vmem [shape: f32[1,128], index: 4, kind: input, shape index: {}]   ;;  %s1563_s5 = inlined_call_operand.vmem [shape: f32[1,16,128], index: 5, kind: output, shape index: {}]  }
   0x1   :  { %v624_v0 = vld [vmem:[%s1558_s1 + $0x80] sm:$0xff]  ;;  %v625_v1 = vld [vmem:[%s1558_s1 + $0x88] sm:$0xff]  ;;  %v626_v2 = vld [vmem:[%s1558_s1 + $0x90] sm:$0xff]  ;;  %22 = vst [vmem:[#allocation2] sm:$0x1] %v1209_v3 }
   0x2   :  { %23 = vst [vmem:[#allocation2 + $0x11] sm:$0x1] %v1209_v3  ;;  %v1008_v4 = vpack.c.bf16 %v625_v1, %v624_v0  ;;  %v627_v5 = vld [vmem:[%s1558_s1 + $0x98] sm:$0xff]  ;;  %v628_v7 = vld [vmem:[%s1558_s1 + $0xa0] sm:$0xff]  ;;  %v629_v8 = vld [vmem:[%s1558_s1 + $0xa8] sm:$0xff] }
   0x3   :  { %v1012_v6 = vpack.c.bf16 %v627_v5, %v626_v2  ;;  %v1016_v9 = vpack.c.bf16 %v629_v8, %v628_v7  ;;  %v1261_v10 = vld [vmem:[%s1559_s0] sm:$0xff]  ;;  %v630_v11 = vld [vmem:[%s1558_s1 + $0xb0] sm:$0xff]  ;;  %v631_v12 = vld [vmem:[%s1558_s1 + $0xb8] sm:$0xff] }
   0x4   :  { %1009 = vmatprep.subr.bf16.mxu0 %v1008_v4  ;;  %24 = vst [vmem:[#allocation2 + $0x1] sm:$0xff] %v1261_v10  ;;  %830 = vmatprep.mubr.f32.mxu0 %v1261_v10  ;;  %v1274_v13 = vld [vmem:[%s1559_s0 + $0x8] sm:$0xff]  ;;  %v1020_v14 = vpack.c.bf16 %v631_v12, %v630_v11  ;;  %v632_v15 = vld [vmem:[%s1558_s1 + $0xc0] sm:$0xff]  ;;  %v634_v18 = vld [vmem:[%s1558_s1 + $0xd0] sm:$0xff] }
   0x5   :  { %1011 = vmatpush3.bf16.msra.mxu0 %v1008_v4  ;;  %25 = vst [vmem:[#allocation2 + $0x9] sm:$0xff] %v1274_v13  ;;  %v633_v16 = vld [vmem:[%s1558_s1 + $0xc8] sm:$0xff]  ;;  %v635_v19 = vld [vmem:[%s1558_s1 + $0xd8] sm:$0xff]  ;;  %v636_v21 = vld [vmem:[%s1558_s1 + $0xe0] sm:$0xff] }
   0x6   :  { %1013 = vmatprep.subr.bf16.mxu0 %v1012_v6  ;;  %v1024_v17 = vpack.c.bf16 %v633_v16, %v632_v15  ;;  %v1028_v20 = vpack.c.bf16 %v635_v19, %v634_v18  ;;  %v637_v22 = vld [vmem:[%s1558_s1 + $0xe8] sm:$0xff]  ;;  %v657_v23 = vld [vmem:[%s1560_s3 + $0x80] sm:$0xff]  ;;  %v659_v25 = vld [vmem:[%s1560_s3 + $0x90] sm:$0xff] }
   0x7   :  { %v658_v24 = vld [vmem:[%s1560_s3 + $0x88] sm:$0xff]  ;;  %v660_v27 = vld [vmem:[%s1560_s3 + $0x98] sm:$0xff]  ;;  %v661_v29 = vld [vmem:[%s1560_s3 + $0xa0] sm:$0xff]  ;;  %v1032_v31 = vpack.c.bf16 %v637_v22, %v636_v21 }
   0x8   :  { %v1104_v26 = vpack.c.bf16 %v658_v24, %v657_v23  ;;  %v1108_v28 = vpack.c.bf16 %v660_v27, %v659_v25  ;;  %v662_v30 = vld [vmem:[%s1560_s3 + $0xa8] sm:$0xff]  ;;  %v638_v32 = vld [vmem:[%s1558_s1 + $0xf0] sm:$0xff]  ;;  %v639_v33 = vld [vmem:[%s1558_s1 + $0xf8] sm:$0xff] }
   0x9   :  { %1015 = vmatpush3.bf16.msra.mxu0 %v1012_v6  ;;  %v1112_v34 = vpack.c.bf16 %v662_v30, %v661_v29  ;;  %v663_v35 = vld [vmem:[%s1560_s3 + $0xb0] sm:$0xff]  ;;  %v664_v36 = vld [vmem:[%s1560_s3 + $0xb8] sm:$0xff]  ;;  %v1036_v37 = vpack.c.bf16 %v639_v33, %v638_v32  ;;  %v28_v38 = vld [vmem:[%s1558_s1] sm:$0xff] }
   0xa   :  { %1017 = vmatprep.subr.bf16.mxu0 %v1016_v9  ;;  %1105 = vmatprep.subr.bf16.mxu1 %v1104_v26  ;;  %v29_v39 = vld [vmem:[%s1558_s1 + $0x8] sm:$0xff]  ;;  %v1116_v40 = vpack.c.bf16 %v664_v36, %v663_v35  ;;  %v30_v42 = vld [vmem:[%s1558_s1 + $0x10] sm:$0xff]  ;;  %v31_v43 = vld [vmem:[%s1558_s1 + $0x18] sm:$0xff] }
   0xb   :  { %1107 = vmatpush3.bf16.msra.mxu1 %v1104_v26  ;;  %v1040_v41 = vpack.c.bf16 %v29_v39, %v28_v38  ;;  %v1044_v44 = vpack.c.bf16 %v31_v43, %v30_v42  ;;  %v26_v45 = vld [vmem:[#allocation2] sm:$0xff]  ;;  %v33_v47 = vld [vmem:[%s1558_s1 + $0x28] sm:$0xff]  ;;  %v34_v49 = vld [vmem:[%s1558_s1 + $0x30] sm:$0xff] }
   0xc   :  { %1109 = vmatprep.subr.bf16.mxu1 %v1108_v28  ;;  %v32_v46 = vld [vmem:[%s1558_s1 + $0x20] sm:$0xff]  ;;  %v35_v50 = vld [vmem:[%s1558_s1 + $0x38] sm:$0xff]  ;;  %v37_v53 = vld [vmem:[%s1558_s1 + $0x48] sm:$0xff] }
   0xd   :  { %1019 = vmatpush3.bf16.msra.mxu0 %v1016_v9  ;;  %v1048_v48 = vpack.c.bf16 %v33_v47, %v32_v46  ;;  %v1052_v51 = vpack.c.bf16 %v35_v50, %v34_v49  ;;  %v36_v52 = vld [vmem:[%s1558_s1 + $0x40] sm:$0xff]  ;;  %v38_v55 = vld [vmem:[%s1558_s1 + $0x50] sm:$0xff]  ;;  %v39_v56 = vld [vmem:[%s1558_s1 + $0x58] sm:$0xff] }
   0xe   :  { %1021 = vmatprep.subr.bf16.mxu0 %v1020_v14  ;;  %v1056_v54 = vpack.c.bf16 %v37_v53, %v36_v52  ;;  %v1060_v57 = vpack.c.bf16 %v39_v56, %v38_v55  ;;  %v40_v58 = vld [vmem:[%s1558_s1 + $0x60] sm:$0xff]  ;;  %v41_v59 = vld [vmem:[%s1558_s1 + $0x68] sm:$0xff]  ;;  %v42_v61 = vld [vmem:[%s1558_s1 + $0x70] sm:$0xff] }
   0xf   :  { %1111 = vmatpush3.bf16.msra.mxu1 %v1108_v28  ;;  %v1064_v60 = vpack.c.bf16 %v41_v59, %v40_v58  ;;  %v43_v62 = vld [vmem:[%s1558_s1 + $0x78] sm:$0xff]  ;;  %v640_v0 = vld [vmem:[%s1558_s1 + $0x100] sm:$0xff]  ;;  %v641_v1 = vld [vmem:[%s1558_s1 + $0x108] sm:$0xff] }
  0x10   :  { %1113 = vmatprep.subr.bf16.mxu1 %v1112_v34  ;;  %v1068_v63 = vpack.c.bf16 %v43_v62, %v42_v61  ;;  %v1072_v2 = vpack.c.bf16 %v641_v1, %v640_v0  ;;  %v642_v3 = vld [vmem:[%s1558_s1 + $0x110] sm:$0xff]  ;;  %v643_v4 = vld [vmem:[%s1558_s1 + $0x118] sm:$0xff]  ;;  %v27_v5 = vld [vmem:[#allocation2 + $0x8] sm:$0xff] }
  0x11   :  { %1023 = vmatpush3.bf16.msra.mxu0 %v1020_v14  ;;  %v1076_v6 = vpack.c.bf16 %v643_v4, %v642_v3  ;;  %v213_v7 = vld [vmem:[#allocation2 + $0x2] sm:$0xff]  ;;  %v646_v12 = vld [vmem:[%s1558_s1 + $0x130] sm:$0xff]  ;;  %v647_v14 = vld [vmem:[%s1558_s1 + $0x138] sm:$0xff] }
  0x12   :  { %1025 = vmatprep.subr.bf16.mxu0 %v1024_v17  ;;  %v644_v8 = vld [vmem:[%s1558_s1 + $0x120] sm:$0xff]  ;;  %v645_v9 = vld [vmem:[%s1558_s1 + $0x128] sm:$0xff]  ;;  %v1084_v15 = vpack.c.bf16 %v647_v14, %v646_v12  ;;  %v650_v19 = vld [vmem:[%s1558_s1 + $0x150] sm:$0xff] }
  0x13   :  { %1115 = vmatpush3.bf16.msra.mxu1 %v1112_v34  ;;  %v1080_v11 = vpack.c.bf16 %v645_v9, %v644_v8  ;;  %v648_v16 = vld [vmem:[%s1558_s1 + $0x140] sm:$0xff]  ;;  %v653_v23 = vld [vmem:[%s1558_s1 + $0x168] sm:$0xff]  ;;  %v654_v25 = vld [vmem:[%s1558_s1 + $0x170] sm:$0xff] }
  0x14   :  { %1117 = vmatprep.subr.bf16.mxu1 %v1116_v40  ;;  %v652_v22 = vld [vmem:[%s1558_s1 + $0x160] sm:$0xff]  ;;  %v655_v26 = vld [vmem:[%s1558_s1 + $0x178] sm:$0xff]  ;;  %v214_v28 = vld [vmem:[#allocation2 + $0xa] sm:$0xff] }
  0x15   :  { %1027 = vmatpush3.bf16.msra.mxu0 %v1024_v17  ;;  %v649_v17 = vld [vmem:[%s1558_s1 + $0x148] sm:$0xff]  ;;  %v1096_v24 = vpack.c.bf16 %v653_v23, %v652_v22  ;;  %v1100_v27 = vpack.c.bf16 %v655_v26, %v654_v25  ;;  %v665_v29 = vld [vmem:[%s1560_s3 + $0xc0] sm:$0xff]  ;;  %v667_v32 = vld [vmem:[%s1560_s3 + $0xd0] sm:$0xff] }
  0x16   :  { %1029 = vmatprep.subr.bf16.mxu0 %v1028_v20  ;;  %v1088_v18 = vpack.c.bf16 %v649_v17, %v648_v16  ;;  %v666_v30 = vld [vmem:[%s1560_s3 + $0xc8] sm:$0xff]  ;;  %v668_v33 = vld [vmem:[%s1560_s3 + $0xd8] sm:$0xff]  ;;  %v669_v35 = vld [vmem:[%s1560_s3 + $0xe0] sm:$0xff] }
  0x17   :  { %1119 = vmatpush3.bf16.msra.mxu1 %v1116_v40  ;;  %v1124_v34 = vpack.c.bf16 %v668_v33, %v667_v32  ;;  %v670_v36 = vld [vmem:[%s1560_s3 + $0xe8] sm:$0xff]  ;;  %v671_v38 = vld [vmem:[%s1560_s3 + $0xf0] sm:$0xff]  ;;  %v672_v39 = vld [vmem:[%s1560_s3 + $0xf8] sm:$0xff] }
  0x18   :  { %v1132_v40 = vpack.c.bf16 %v672_v39, %v671_v38  ;;  %v327_v42 = vld [vmem:[%s1560_s3 + $0x8] sm:$0xff]  ;;  %v329_v52 = vld [vmem:[%s1560_s3 + $0x18] sm:$0xff]  ;;  %v330_v56 = vld [vmem:[%s1560_s3 + $0x20] sm:$0xff] }
  0x19   :  { %1031 = vmatpush3.bf16.msra.mxu0 %v1028_v20  ;;  %v651_v20 = vld [vmem:[%s1558_s1 + $0x158] sm:$0xff]  ;;  %v332_v59 = vld [vmem:[%s1560_s3 + $0x30] sm:$0xff]  ;;  %v335_v0 = vld [vmem:[%s1560_s3 + $0x48] sm:$0xff] }
  0x1a   :  { %1033 = vmatprep.subr.bf16.mxu0 %v1032_v31  ;;  %v1092_v21 = vpack.c.bf16 %v651_v20, %v650_v19  ;;  %v337_v3 = vld [vmem:[%s1560_s3 + $0x58] sm:$0xff]  ;;  %v340_v8 = vld [vmem:[%s1560_s3 + $0x70] sm:$0xff]  ;;  %v673_v12 = vld [vmem:[%s1560_s3 + $0x100] sm:$0xff] }
  0x1b   :  { %v341_v9 = vld [vmem:[%s1560_s3 + $0x78] sm:$0xff]  ;;  %v674_v14 = vld [vmem:[%s1560_s3 + $0x108] sm:$0xff]  ;;  %v675_v16 = vld [vmem:[%s1560_s3 + $0x110] sm:$0xff] }
  0x1c   :  { %v676_v17 = vld [vmem:[%s1560_s3 + $0x118] sm:$0xff]  ;;  %v677_v20 = vld [vmem:[%s1560_s3 + $0x120] sm:$0xff] }
  0x1d   :  { %1035 = vmatpush3.bf16.msra.mxu0 %v1032_v31  ;;  %v1120_v31 = vpack.c.bf16 %v666_v30, %v665_v29  ;;  %v680_v25 = vld [vmem:[%s1560_s3 + $0x138] sm:$0xff]  ;;  %v683_v30 = vld [vmem:[%s1560_s3 + $0x150] sm:$0xff]  ;;  %v685_v33 = vld [vmem:[%s1560_s3 + $0x160] sm:$0xff] }
  0x1e   :  { %1037 = vmatprep.subr.bf16.mxu0 %v1036_v37 }
  0x1f   :  { %1121 = vmatprep.subr.bf16.mxu1 %v1120_v31 }
  0x20   :  { %1123 = vmatpush3.bf16.msra.mxu1 %v1120_v31  ;;  %v684_v31 = vld [vmem:[%s1560_s3 + $0x158] sm:$0xff] }
  0x21   :  { %1039 = vmatpush3.bf16.msra.mxu0 %v1036_v37  ;;  %1125 = vmatprep.subr.bf16.mxu1 %v1124_v34  ;;  %v1128_v37 = vpack.c.bf16 %v670_v36, %v669_v35  ;;  %v1188_v32 = vpack.c.bf16 %v684_v31, %v683_v30  ;;  %v687_v36 = vld [vmem:[%s1560_s3 + $0x170] sm:$0xff] }
  0x22   :  { %1041 = vmatprep.subr.bf16.mxu0 %v1040_v41 }
  0x24   :  { %831 = vmatmul.mubr.f32.vlgmr.msra.gmra.mrb[0].mxu0 %v1274_v13  ;;  %1127 = vmatpush3.bf16.msra.mxu1 %v1124_v34  ;;  %v686_v34 = vld [vmem:[%s1560_s3 + $0x168] sm:$0xff] }
  0x25   :  { %1043 = vmatpush3.bf16.msra.mxu0 %v1040_v41  ;;  %865 = vmatprep.mubr.f32.mxu0 %v26_v45  ;;  %v326_v41 = vld [vmem:[%s1560_s3] sm:$0xff]  ;;  %v1192_v35 = vpack.c.bf16 %v686_v34, %v685_v33 }
  0x26   :  { %1045 = vmatprep.subr.bf16.mxu0 %v1044_v44  ;;  %1129 = vmatprep.subr.bf16.mxu1 %v1128_v37  ;;  %v1136_v43 = vpack.c.bf16 %v327_v42, %v326_v41 }
  0x28   :  { %1131 = vmatpush3.bf16.msra.mxu1 %v1128_v37  ;;  %v688_v37 = vld [vmem:[%s1560_s3 + $0x178] sm:$0xff] }
  0x29   :  { %1047 = vmatpush3.bf16.msra.mxu0 %v1044_v44  ;;  %1133 = vmatprep.subr.bf16.mxu1 %v1132_v40  ;;  %v656_v44 = vld [vmem:[%s1561_s2] ss:$0 sm:$0xff]  ;;  %v1196_v38 = vpack.c.bf16 %v688_v37, %v687_v36 }
  0x2a   :  { %1049 = vmatprep.subr.bf16.mxu0 %v1048_v48 }
  0x2c   :  { %1135 = vmatpush3.bf16.msra.mxu1 %v1132_v40  ;;  %v689_v40 = vld [vmem:[%s1562_s4] ss:$0 sm:$0xff] }
  0x2d   :  { %1051 = vmatpush3.bf16.msra.mxu0 %v1048_v48  ;;  %1137 = vmatprep.subr.bf16.mxu1 %v1136_v43 }
  0x2e   :  { %1053 = vmatprep.subr.bf16.mxu0 %v1052_v51 }
  0x31   :  { %1055 = vmatpush3.bf16.msra.mxu0 %v1052_v51  ;;  %v328_v51 = vld [vmem:[%s1560_s3 + $0x10] sm:$0xff] }
  0x32   :  { %1057 = vmatprep.subr.bf16.mxu0 %v1056_v54  ;;  %v1140_v55 = vpack.c.bf16 %v329_v52, %v328_v51 }
  0x35   :  { %1059 = vmatpush3.bf16.msra.mxu0 %v1056_v54 }
  0x36   :  { %1061 = vmatprep.subr.bf16.mxu0 %v1060_v57 }
  0x39   :  { %1063 = vmatpush3.bf16.msra.mxu0 %v1060_v57  ;;  %v331_v57 = vld [vmem:[%s1560_s3 + $0x28] sm:$0xff] }
  0x3a   :  { %1065 = vmatprep.subr.bf16.mxu0 %v1064_v60  ;;  %v1144_v58 = vpack.c.bf16 %v331_v57, %v330_v56 }
  0x3d   :  { %1067 = vmatpush3.bf16.msra.mxu0 %v1064_v60  ;;  %v333_v60 = vld [vmem:[%s1560_s3 + $0x38] sm:$0xff] }
  0x3e   :  { %1069 = vmatprep.subr.bf16.mxu0 %v1068_v63  ;;  %v1148_v62 = vpack.c.bf16 %v333_v60, %v332_v59 }
  0x41   :  { %1071 = vmatpush3.bf16.msra.mxu0 %v1068_v63  ;;  %v334_v63 = vld [vmem:[%s1560_s3 + $0x40] sm:$0xff] }
  0x42   :  { %1073 = vmatprep.subr.bf16.mxu0 %v1072_v2  ;;  %v1152_v1 = vpack.c.bf16 %v335_v0, %v334_v63 }
  0x44   :  { %866 = vmatmul.mubr.f32.vlgmr.msra.gmra.mrb[0].mxu0 %v27_v5  ;;  %v338_v5 = vld [vmem:[%s1560_s3 + $0x60] sm:$0xff] }
  0x45   :  { %1075 = vmatpush3.bf16.msra.mxu0 %v1072_v2  ;;  %900 = vmatprep.mubr.f32.mxu0 %v213_v7  ;;  %v336_v2 = vld [vmem:[%s1560_s3 + $0x50] sm:$0xff] }
  0x46   :  { %1077 = vmatprep.subr.bf16.mxu0 %v1076_v6  ;;  %v1156_v4 = vpack.c.bf16 %v337_v3, %v336_v2 }
  0x49   :  { %1079 = vmatpush3.bf16.msra.mxu0 %v1076_v6  ;;  %v339_v6 = vld [vmem:[%s1560_s3 + $0x68] sm:$0xff] }
  0x4a   :  { %1081 = vmatprep.subr.bf16.mxu0 %v1080_v11  ;;  %v1160_v7 = vpack.c.bf16 %v339_v6, %v338_v5 }
  0x4d   :  { %1083 = vmatpush3.bf16.msra.mxu0 %v1080_v11  ;;  %v1164_v11 = vpack.c.bf16 %v341_v9, %v340_v8 }
  0x4e   :  { %1085 = vmatprep.subr.bf16.mxu0 %v1084_v15 }
  0x51   :  { %1087 = vmatpush3.bf16.msra.mxu0 %v1084_v15  ;;  %v1168_v15 = vpack.c.bf16 %v674_v14, %v673_v12 }
  0x52   :  { %1089 = vmatprep.subr.bf16.mxu0 %v1088_v18 }
  0x55   :  { %1091 = vmatpush3.bf16.msra.mxu0 %v1088_v18  ;;  %v1172_v18 = vpack.c.bf16 %v676_v17, %v675_v16 }
  0x56   :  { %1093 = vmatprep.subr.bf16.mxu0 %v1092_v21 }
  0x59   :  { %1095 = vmatpush3.bf16.msra.mxu0 %v1092_v21  ;;  %v678_v21 = vld [vmem:[%s1560_s3 + $0x128] sm:$0xff] }
  0x5a   :  { %1097 = vmatprep.subr.bf16.mxu0 %v1096_v24  ;;  %v1176_v23 = vpack.c.bf16 %v678_v21, %v677_v20 }
  0x5d   :  { %1099 = vmatpush3.bf16.msra.mxu0 %v1096_v24  ;;  %v679_v24 = vld [vmem:[%s1560_s3 + $0x130] sm:$0xff] }
  0x5e   :  { %1101 = vmatprep.subr.bf16.mxu0 %v1100_v27  ;;  %v1180_v26 = vpack.c.bf16 %v680_v25, %v679_v24 }
  0x61   :  { %1103 = vmatpush3.bf16.msra.mxu0 %v1100_v27  ;;  %v681_v27 = vld [vmem:[%s1560_s3 + $0x140] sm:$0xff] }
  0x64   :  { %901 = vmatmul.mubr.f32.vlgmr.msra.gmra.mrb[0].mxu0 %v214_v28  ;;  %v682_v28 = vld [vmem:[%s1560_s3 + $0x148] sm:$0xff] }
  0x65   :  { %v1184_v29 = vpack.c.bf16 %v682_v28, %v681_v27 }
 0x137   :  { %v902_v45 = vpop.f32.mrb[0].mxu0 }
 0x138   :  { %v317_v46 = vadd.f32 %v902_v45, %v656_v44  ;;  %v298_v47 = vpop.f32.mrb[1].mxu0 }
 0x139   :  { %v316_v48 = vadd.f32 %v656_v44, %v298_v47 }
 0x13a   :  { %v319_v49 = vmax.f32 %v317_v46, 0.0 }
 0x13b   :  { %v318_v50 = vmax.f32 %v316_v48, 0.0 }
 0x13c   :  { %v321_v53 = vadd.f32 %v319_v49, %v1274_v13 }
 0x13d   :  { %v320_v54 = vadd.f32 %v318_v50, %v1261_v10 }
 0x13e   :  { %323 = vst [vmem:[#allocation2 + $0x9] sm:$0xff] %v321_v53 }
 0x13f   :  { %322 = vst [vmem:[#allocation2 + $0x1] sm:$0xff] %v320_v54  ;;  %935 = vmatprep.mubr.f32.mxu1 %v320_v54 }
 0x140   :  { %936 = vmatmul.mubr.f32.vlgmr.msra.gmra.mrb[0].mxu1 %v321_v53 }
 0x141   :  { %1139 = vmatpush3.bf16.msra.mxu1 %v1136_v43 }
 0x142   :  { %1141 = vmatprep.subr.bf16.mxu1 %v1140_v55 }
 0x145   :  { %1143 = vmatpush3.bf16.msra.mxu1 %v1140_v55  ;;  %v512_v39 = vld [vmem:[#allocation2 + $0xa] sm:$0xff] }
 0x146   :  { %v324_v61 = vld [vmem:[#allocation2] sm:$0xff]  ;;  %1145 = vmatprep.subr.bf16.mxu1 %v1144_v58  ;;  %v325_v19 = vld [vmem:[#allocation2 + $0x8] sm:$0xff] }
 0x147   :  { %970 = vmatprep.mubr.f32.mxu1 %v324_v61  ;;  %v511_v22 = vld [vmem:[#allocation2 + $0x2] sm:$0xff] }
 0x149   :  { %1147 = vmatpush3.bf16.msra.mxu1 %v1144_v58 }
 0x14a   :  { %1149 = vmatprep.subr.bf16.mxu1 %v1148_v62 }
 0x14d   :  { %1151 = vmatpush3.bf16.msra.mxu1 %v1148_v62 }
 0x14e   :  { %1153 = vmatprep.subr.bf16.mxu1 %v1152_v1 }
 0x151   :  { %1155 = vmatpush3.bf16.msra.mxu1 %v1152_v1 }
 0x152   :  { %1157 = vmatprep.subr.bf16.mxu1 %v1156_v4 }
 0x155   :  { %1159 = vmatpush3.bf16.msra.mxu1 %v1156_v4 }
 0x156   :  { %1161 = vmatprep.subr.bf16.mxu1 %v1160_v7 }
 0x159   :  { %1163 = vmatpush3.bf16.msra.mxu1 %v1160_v7 }
 0x15a   :  { %1165 = vmatprep.subr.bf16.mxu1 %v1164_v11 }
 0x15d   :  { %1167 = vmatpush3.bf16.msra.mxu1 %v1164_v11 }
 0x15e   :  { %1169 = vmatprep.subr.bf16.mxu1 %v1168_v15 }
 0x160   :  { %971 = vmatmul.mubr.f32.vlgmr.msra.gmra.mrb[0].mxu1 %v325_v19 }
 0x161   :  { %1171 = vmatpush3.bf16.msra.mxu1 %v1168_v15  ;;  %1005 = vmatprep.mubr.f32.mxu1 %v511_v22 }
 0x162   :  { %1173 = vmatprep.subr.bf16.mxu1 %v1172_v18 }
 0x165   :  { %1175 = vmatpush3.bf16.msra.mxu1 %v1172_v18 }
 0x166   :  { %1177 = vmatprep.subr.bf16.mxu1 %v1176_v23 }
 0x169   :  { %1179 = vmatpush3.bf16.msra.mxu1 %v1176_v23 }
 0x16a   :  { %1181 = vmatprep.subr.bf16.mxu1 %v1180_v26 }
 0x16d   :  { %1183 = vmatpush3.bf16.msra.mxu1 %v1180_v26 }
 0x16e   :  { %1185 = vmatprep.subr.bf16.mxu1 %v1184_v29 }
 0x171   :  { %1187 = vmatpush3.bf16.msra.mxu1 %v1184_v29 }
 0x172   :  { %1189 = vmatprep.subr.bf16.mxu1 %v1188_v32 }
 0x175   :  { %1191 = vmatpush3.bf16.msra.mxu1 %v1188_v32 }
 0x176   :  { %1193 = vmatprep.subr.bf16.mxu1 %v1192_v35 }
 0x179   :  { %1195 = vmatpush3.bf16.msra.mxu1 %v1192_v35 }
 0x17a   :  { %1197 = vmatprep.subr.bf16.mxu1 %v1196_v38 }
 0x17d   :  { %1199 = vmatpush3.bf16.msra.mxu1 %v1196_v38 }
 0x180   :  { %1006 = vmatmul.mubr.f32.vlgmr.msra.gmra.mrb[0].mxu1 %v512_v39 }
 0x253   :  { %v1007_v41 = vpop.f32.mrb[0].mxu1 }
 0x254   :  { %v615_v42 = vadd.f32 %v1007_v41, %v689_v40  ;;  %v596_v43 = vpop.f32.mrb[1].mxu1 }
 0x255   :  { %v614_v44 = vadd.f32 %v689_v40, %v596_v43 }
 0x256   :  { %v617_v45 = vadd.f32 %v615_v42, %v1274_v13 }
 0x257   :  { %v616_v46 = vadd.f32 %v614_v44, %v1261_v10 }
 0x258   :  { %619 = vst [vmem:[%s1563_s5 + $0x8] sm:$0xff] %v617_v45 }
 0x259   :  { %618 = vst [vmem:[%s1563_s5] sm:$0xff] %v616_v46 }

</bundles_post_ra>
